<compile_context>
chip_gen: v6e
topology: v6e:2x2x1
jax: 0.10.0
libtpu: 0.0.40
codegen_flags: <defaults>
</compile_context>

<pallas_src>
from functools import lru_cache

import numpy as np
import jax
import jax.numpy as jnp
from jax import lax
from jax.experimental import pallas as pl
from jax.experimental.pallas import tpu as pltpu


# ============================================================================
# small helpers
# ============================================================================
def _round_up(x, m):
    return (x + m - 1) // m * m


def _pick_divisor_tile(dim, candidates):
    for c in candidates:
        if dim % c == 0:
            return c
    return dim  # full-extent block (only hit for tiny / already-padded dims)


def _pack_bf16_rows_to_u32(w_bf16):
    """Pack column pairs of a bf16 [R, C] matrix into uint32 [R, C//2].

    word = bits(col 2c) | bits(col 2c+1) << 16.  Row DMAs of the packed array
    move bf16-sized bytes with plain 32-bit granularity.
    """
    R, C = w_bf16.shape
    assert C % 2 == 0, "feature dim must be even for u32 packing"
    lo = lax.bitcast_convert_type(w_bf16[:, 0::2], jnp.uint16).astype(jnp.uint32)
    hi = lax.bitcast_convert_type(w_bf16[:, 1::2], jnp.uint16).astype(jnp.uint32)
    return lo | (hi << 16)


# ============================================================================
# Kernel 1: dense tiled matmul  out[M, N] = x[M, D] @ Wt[D, N]   (prefill)
# bf16 operands on the MXU, f32 VMEM accumulator, reduction axis last.
# ============================================================================
def _dense_matmul_kernel(x_ref, wt_ref, o_ref, acc_ref):
    @pl.when(pl.program_id(2) == 0)
    def _():
        acc_ref[...] = jnp.zeros_like(acc_ref)

    acc_ref[...] += jnp.dot(x_ref[...], wt_ref[...],
                            preferred_element_type=jnp.float32)

    @pl.when(pl.program_id(2) == pl.num_programs(2) - 1)
    def _():
        o_ref[...] = acc_ref[...].astype(o_ref.dtype)


@lru_cache(maxsize=None)
def _build_dense_matmul(M_pad, D, N, tm, tn, tk, in_dtype, out_dtype, vmem_limit):
    call = pl.pallas_call(
        _dense_matmul_kernel,
        out_shape=jax.ShapeDtypeStruct((M_pad, N), jnp.dtype(out_dtype)),
        grid_spec=pltpu.PrefetchScalarGridSpec(
            num_scalar_prefetch=0,
            grid=(M_pad // tm, N // tn, D // tk),
            in_specs=[pl.BlockSpec((tm, tk), lambda i, j, k: (i, k)),
                      pl.BlockSpec((tk, tn), lambda i, j, k: (k, j))],
            out_specs=pl.BlockSpec((tm, tn), lambda i, j, k: (i, j)),
            scratch_shapes=[pltpu.VMEM((tm, tn), jnp.float32)]),
        compiler_params=pltpu.CompilerParams(
            dimension_semantics=("parallel", "parallel", "arbitrary"),
            vmem_limit_bytes=vmem_limit),
    )
    return jax.jit(call)


def dense_matmul(x2d, w_t, out_dtype):
    """out[M, N] = x2d[M, D] @ w_t[D, N]   (w_t = pre-transposed, pre-padded)."""
    M, D = x2d.shape
    D2, N = w_t.shape
    assert D == D2 and D % 128 == 0 and N % 128 == 0

    # HBM-reuse-friendly tiles: large tm so the [D, N] weight is re-streamed
    # only M_pad/tm times; moderate tk keeps double-buffered tiles small.
    if M >= 1024:
        tm = 512
    elif M >= 256:
        tm = 256
    elif M >= 128:
        tm = 128
    else:
        tm = _round_up(M, 16)  # bf16 sublane-packing friendly
    M_pad = _round_up(M, tm)
    tn = _pick_divisor_tile(N, (512, 256, 128))
    tk = _pick_divisor_tile(D, (512, 1024, 256, 128))

    in_b = jnp.dtype(x2d.dtype).itemsize
    out_b = jnp.dtype(out_dtype).itemsize
    est = 2 * (tm * tk + tk * tn) * in_b + tm * tn * 4 + 2 * tm * tn * out_b
    # cap below physical v7x VMEM (64 MiB) so compiler scratch/sems have room
    vmem_limit = int(min(48 * 2 ** 20, max(32 * 2 ** 20, 2 * est)))

    x_p = jnp.pad(x2d, ((0, M_pad - M), (0, 0))) if M_pad != M else x2d
    call = _build_dense_matmul(M_pad, D, N, tm, tn, tk,
                               np.dtype(x2d.dtype).name,
                               np.dtype(out_dtype).name, vmem_limit)
    out = call(x_p, w_t)
    return out[:M] if M_pad != M else out


# ============================================================================
# Kernel 2: decode path -- gather only the K selected weight rows from HBM
# via async DMAs (weight never fully enters VMEM), then MXU matmul in bf16.
#
#   up/gate : out[M, K_pad] = x[M, C] @ G[K_pad, C].T
#             (x arrives pre-split into even/odd column halves, bf16)
#   down    : out[M, C]     = x[M, K_pad] @ G[K_pad, C]
#             (output columns come back as [even half | odd half]; caller
#              interleaves them back)
#
# Double-buffered gather (chunk j+1 issued before computing chunk j); chunks
# that lie entirely in the contiguous base-neuron prefix use ONE large DMA.
# ============================================================================
def _make_gather_kernels(k_chunk, C_half, n_base_full_chunks):

    def _issue_chunk(jj, slot, idx_ref, w_hbm, g_ref, sem):
        # Chunks fully inside the contiguous base-neuron prefix (indices
        # 0..base-1 are always 0,1,2,...) move with ONE coalesced DMA.
        @pl.when(jj < n_base_full_chunks)
        def _():
            start = pl.multiple_of(jj * k_chunk, k_chunk)
            pltpu.make_async_copy(w_hbm.at[pl.ds(start, k_chunk), :],
                                  g_ref.at[slot], sem.at[slot]).start()

        @pl.when(jj >= n_base_full_chunks)
        def _():
            base = jj * k_chunk

            def issue(k, carry):
                r = idx_ref[base + k]
                pltpu.make_async_copy(w_hbm.at[pl.ds(r, 1), :],
                                      g_ref.at[slot, pl.ds(k, 1), :],
                                      sem.at[slot]).start()
                return carry
            lax.fori_loop(0, k_chunk, issue, 0, unroll=8)

    def _wait_chunk(slot, w_hbm, g_ref, sem):
        # DMA semaphores count BYTES: either issuance pattern above moves
        # exactly k_chunk * C_half * 4 bytes into g_ref[slot] on sem[slot],
        # so a single full-slot wait drains the whole chunk regardless of how
        # the issue side was split into descriptors.
        pltpu.make_async_copy(w_hbm.at[pl.ds(0, k_chunk), :],
                              g_ref.at[slot], sem.at[slot]).wait()

    def _unpack_halves(g_u32):
        # Exact bf16 values of the packed weights, kept as two C_half-wide
        # halves (no concatenate, no full-width f32 intermediate).
        even = pltpu.bitcast(g_u32 << 16, jnp.float32).astype(jnp.bfloat16)
        odd = pltpu.bitcast(g_u32 & jnp.uint32(0xFFFF0000),
                            jnp.float32).astype(jnp.bfloat16)
        return even, odd

    def up_kernel(idx_ref, xe_ref, xo_ref, w_hbm, o_ref, g_ref, sem):
        j = pl.program_id(0)
        n = pl.num_programs(0)
        slot = j % 2

        @pl.when(j == 0)
        def _():
            _issue_chunk(j, slot, idx_ref, w_hbm, g_ref, sem)

        _wait_chunk(slot, w_hbm, g_ref, sem)

        @pl.when(j + 1 < n)
        def _():
            _issue_chunk(j + 1, 1 - slot, idx_ref, w_hbm, g_ref, sem)

        even, odd = _unpack_halves(g_ref[slot])                  # (k_chunk, C/2)
        acc = lax.dot_general(xe_ref[...], even,
                              dimension_numbers=(((1,), (1,)), ((), ())),
                              preferred_element_type=jnp.float32)
        acc += lax.dot_general(xo_ref[...], odd,
                               dimension_numbers=(((1,), (1,)), ((), ())),
                               preferred_element_type=jnp.float32)
        o_ref[...] = acc.astype(o_ref.dtype)

    def down_kernel(idx_ref, x_ref, w_hbm, o_ref, g_ref, sem,
                    acc_e_ref, acc_o_ref):
        j = pl.program_id(0)
        n = pl.num_programs(0)
        slot = j % 2

        @pl.when(j == 0)
        def _():
            acc_e_ref[...] = jnp.zeros_like(acc_e_ref)
            acc_o_ref[...] = jnp.zeros_like(acc_o_ref)
            _issue_chunk(j, slot, idx_ref, w_hbm, g_ref, sem)

        _wait_chunk(slot, w_hbm, g_ref, sem)

        @pl.when(j + 1 < n)
        def _():
            _issue_chunk(j + 1, 1 - slot, idx_ref, w_hbm, g_ref, sem)

        even, odd = _unpack_halves(g_ref[slot])                  # (k_chunk, C/2)
        acc_e_ref[...] += jnp.dot(x_ref[...], even,
                                  preferred_element_type=jnp.float32)
        acc_o_ref[...] += jnp.dot(x_ref[...], odd,
                                  preferred_element_type=jnp.float32)

        @pl.when(j == n - 1)
        def _():
            o_ref[:, :C_half] = acc_e_ref[...].astype(o_ref.dtype)
            o_ref[:, C_half:] = acc_o_ref[...].astype(o_ref.dtype)

    return up_kernel, down_kernel


@lru_cache(maxsize=None)
def _build_gathered_matmul(M, C_half, K_pad, k_chunk, n_base_full_chunks,
                           transpose_gathered, out_dtype):
    # TODO(synk): on v7x, shard decode chunks across the 2 TensorCores
    # ("parallel" axis / core_map); the cross-step prefetch prologue below
    # assumes sequential chunk order, so we keep "arbitrary" here.
    C = 2 * C_half
    n_chunks = K_pad // k_chunk
    up_kernel, down_kernel = _make_gather_kernels(k_chunk, C_half,
                                                  n_base_full_chunks)
    g_bytes = 2 * k_chunk * C_half * 4
    vmem_limit = int(min(48 * 2 ** 20, max(24 * 2 ** 20, 4 * g_bytes)))

    if transpose_gathered:
        call = pl.pallas_call(
            up_kernel,
            out_shape=jax.ShapeDtypeStruct((M, K_pad), jnp.dtype(out_dtype)),
            grid_spec=pltpu.PrefetchScalarGridSpec(
                num_scalar_prefetch=1,                 # indices land in SMEM
                grid=(n_chunks,),
                in_specs=[pl.BlockSpec((M, C_half), lambda j, idx: (0, 0)),
                          pl.BlockSpec((M, C_half), lambda j, idx: (0, 0)),
                          pl.BlockSpec(memory_space=pl.ANY)],   # weight in HBM
                out_specs=pl.BlockSpec((M, k_chunk), lambda j, idx: (0, j)),
                scratch_shapes=[pltpu.VMEM((2, k_chunk, C_half), jnp.uint32),
                                pltpu.SemaphoreType.DMA((2,))]),
            compiler_params=pltpu.CompilerParams(
                dimension_semantics=("arbitrary",),
                vmem_limit_bytes=vmem_limit),
        )
    else:
        call = pl.pallas_call(
            down_kernel,
            out_shape=jax.ShapeDtypeStruct((M, C), jnp.dtype(out_dtype)),
            grid_spec=pltpu.PrefetchScalarGridSpec(
                num_scalar_prefetch=1,
                grid=(n_chunks,),
                in_specs=[pl.BlockSpec((M, k_chunk), lambda j, idx: (0, j)),
                          pl.BlockSpec(memory_space=pl.ANY)],   # weight in HBM
                out_specs=pl.BlockSpec((M, C), lambda j, idx: (0, 0)),
                scratch_shapes=[pltpu.VMEM((2, k_chunk, C_half), jnp.uint32),
                                pltpu.SemaphoreType.DMA((2,)),
                                pltpu.VMEM((M, C_half), jnp.float32),
                                pltpu.VMEM((M, C_half), jnp.float32)]),
            compiler_params=pltpu.CompilerParams(
                dimension_semantics=("arbitrary",),
                vmem_limit_bytes=vmem_limit),
        )
    return jax.jit(call)


def gathered_matmul_up(x_even, x_odd, w_pack_u32, idx_pad, n_prefix, out_dtype):
    """out[M, K_pad] = x[M, C] @ W[idx, :].T  (x pre-split even/odd, bf16)."""
    M, C_half = x_even.shape
    K_pad = int(idx_pad.shape[0])
    assert K_pad % 128 == 0
    k_chunk = _pick_divisor_tile(K_pad, (256, 128))
    n_base_full_chunks = max(0, int(n_prefix)) // k_chunk
    call = _build_gathered_matmul(M, C_half, K_pad, k_chunk, n_base_full_chunks,
                                  True, np.dtype(out_dtype).name)
    return call(idx_pad, x_even, x_odd, w_pack_u32)


def gathered_matmul_down(x_bf16, w_pack_u32, idx_pad, n_prefix, out_dtype):
    """out[M, C] = x[M, K_pad] @ Wt[idx, :]   (output = [even half | odd half])."""
    M, K_pad = x_bf16.shape
    _, C_half = w_pack_u32.shape
    assert K_pad % 128 == 0
    k_chunk = _pick_divisor_tile(K_pad, (256, 128))
    n_base_full_chunks = max(0, int(n_prefix)) // k_chunk
    call = _build_gathered_matmul(M, C_half, K_pad, k_chunk, n_base_full_chunks,
                                  False, np.dtype(out_dtype).name)
    return call(idx_pad, x_bf16, w_pack_u32)


# ============================================================================
# Neuron-selection glue (mirrors the PyTorch control flow, fully on-device).
# ============================================================================
def _select_indices_on_device(x2d, token_sparsity, num_neurons,
                              base_neuron_num, n_extra):
    # TODO(synk): common.get_core_neurons is external to the reference snippet;
    # approximated here by ranking neurons by how often they land in a token's
    # top-(token_sparsity*num_neurons) activations by magnitude (on-device,
    # top_k based, no host sync).
    base = jnp.arange(base_neuron_num, dtype=jnp.int32)
    if n_extra <= 0:
        return base
    k = min(num_neurons, max(1, int(round(token_sparsity * num_neurons))))
    absx = jnp.abs(x2d.astype(jnp.float32))                       # [T, N]
    kth = jax.lax.top_k(absx, k)[0][:, -1:]                       # k-th largest
    counts = jnp.sum((absx >= kth).astype(jnp.int32), axis=0)
    m = min(num_neurons, base_neuron_num + n_extra)
    _, core = jax.lax.top_k(counts, m)                            # ranked ids
    core = core.astype(jnp.int32)
    keep = core >= base_neuron_num                 # base == arange -> "not isin"
    pos = jnp.where(keep, jnp.cumsum(keep.astype(jnp.int32)) - 1, n_extra)
    extra = jnp.zeros((n_extra,), jnp.int32).at[pos].set(core, mode="drop")
    return jnp.concatenate([base, extra])


INDICES_LIST_ALL = []   # mirrors the module-level global `indices_list_all`


class CustomMLPLayerPallas:
    """Pallas/TPU port of CustomMLPLayer (SiOT sparse MLP projection)."""

    def __init__(self, weight, num, sparsity, start_num, token_sparsity,
                 memory_limit, cpu_only, name, original_neurons_num,
                 siot_method_config):
        neuron_num = round(original_neurons_num * sparsity)
        loaded_neuron_num = weight.shape[1] if 'down' in name else weight.shape[0]
        if neuron_num > loaded_neuron_num:
            raise RuntimeError(
                f'Number of required neurons ({neuron_num}) is larger than the '
                f'number of loaded neurons ({loaded_neuron_num})')
        if siot_method_config['base_neurons_percent'] > sparsity:
            p = siot_method_config['base_neurons_percent']
            raise RuntimeError(
                f'base_neurons_percent ({p}) is larger than sparsity ({sparsity}).')

        self.num = num
        self.name = name
        self.token_sparsity = token_sparsity
        self.sparsity = sparsity
        self.start_num = start_num
        self.neuron_num = neuron_num
        self.original_neurons_num = original_neurons_num
        self.loaded_neuron_num = loaded_neuron_num
        self.base_neurons_percent = siot_method_config['base_neurons_percent']
        self.in_features = int(weight.shape[1])
        self.out_features = int(weight.shape[0])

        # Weight storage:
        #  * w_t          : W.T in bf16, zero-padded to multiples of 128 ->
        #                   lane-dense prefill MXU operand.
        #  * w_gather_u32 : u32-packed bf16 rows of the decode gather source
        #                   ('down' gathers rows of W.T, 'up'/'gate' rows of W).
        # TODO(synk): optional int8 (v5e/v6e) / fp8 (v7x) prefill weight with
        # per-channel scales would halve HBM traffic; bf16 kept for accuracy.
        w_bf16 = jnp.asarray(weight).astype(jnp.bfloat16)
        w_t = jnp.transpose(w_bf16)                              # [in, out]
        gather_src = w_t if 'down' in name else w_bf16
        assert gather_src.shape[1] % 2 == 0
        self.w_gather_u32 = _pack_bf16_rows_to_u32(gather_src)

        self._d_pad = _round_up(self.in_features, 128)
        self._n_pad = _round_up(self.out_features, 128)
        if (self._d_pad, self._n_pad) != w_t.shape:
            w_t = jnp.pad(w_t, ((0, self._d_pad - w_t.shape[0]),
                                (0, self._n_pad - w_t.shape[1])))
        self.w_t = w_t

    def __call__(self, x):
        global INDICES_LIST_ALL
        B, S, F = x.shape
        x2d = x.reshape(B * S, F)

        if S > 1:
            # ---------------- prefill: dense x @ W.T on the MXU ----------------
            xp = x2d.astype(jnp.bfloat16)
            if self._d_pad != F:
                xp = jnp.pad(xp, ((0, 0), (0, self._d_pad - F)))
            out2d = dense_matmul(xp, self.w_t, out_dtype=x.dtype)
            out2d = out2d[:, :self.out_features]
            true_value = out2d.reshape(B, S, self.out_features)

            if 'down' in self.name:
                num_neurons = self.in_features
                base_neuron_num = int(self.base_neurons_percent
                                      * self.original_neurons_num)
                if self.base_neurons_percent < self.sparsity:
                    n_extra = int((self.sparsity - self.base_neurons_percent)
                                  * self.original_neurons_num)
                else:
                    n_extra = 0
                indices_all = _select_indices_on_device(
                    x2d, self.token_sparsity, num_neurons, base_neuron_num,
                    n_extra)
                if self.num == self.start_num + 1:
                    INDICES_LIST_ALL = []
                INDICES_LIST_ALL.append(indices_all)
            return true_value

        # -------- decode: sparse matmul over the selected neurons only --------
        # TODO(synk): fusing gate/up/down of one MLP block into a single kernel
        # would save two pallas_call round-trips, but crosses module instances.
        indices = INDICES_LIST_ALL[self.num - (self.start_num + 1)]
        K = int(indices.shape[0])
        K_pad = _round_up(K, 128)           # lane-dense output / fixed compiles
        idx_pad = indices.astype(jnp.int32)
        if K_pad != K:                      # pad with a valid index (row 0)
            idx_pad = jnp.concatenate(
                [idx_pad, jnp.zeros((K_pad - K,), jnp.int32)])
        # contiguous prefix 0..n_prefix-1 shared by all layers of the block
        n_prefix = int(self.base_neurons_percent * self.original_neurons_num)

        x_bf = x2d.astype(jnp.bfloat16)
        if 'down' in self.name:
            # x @ W[:, idx].T  ==  x @ (W.T)[idx, :]
            if K_pad != K:                  # zero-pad -> padded rows contribute 0
                x_bf = jnp.pad(x_bf, ((0, 0), (0, K_pad - K)))
            out_halves = gathered_matmul_down(x_bf, self.w_gather_u32, idx_pad,
                                              n_prefix, out_dtype=x.dtype)
            C = out_halves.shape[1]         # interleave even/odd column halves
            out2d = jnp.stack([out_halves[:, :C // 2], out_halves[:, C // 2:]],
                              axis=-1).reshape(out_halves.shape[0], C)
        else:
            # x @ W[idx, :].T   (kernel consumes even/odd-split x features)
            out2d = gathered_matmul_up(x_bf[:, 0::2], x_bf[:, 1::2],
                                       self.w_gather_u32, idx_pad, n_prefix,
                                       out_dtype=x.dtype)[:, :K]
        return out2d.reshape(B, 1, -1)


# ============================================================================
# Demo / self-test
# ============================================================================
if __name__ == "__main__":
    batch, seq, hidden, inter = 2, 8, 128, 256
    sparsity, token_sparsity, base_pct = 0.5, 0.1, 0.25
    siot_cfg = {'base_neurons_percent': base_pct}

    key = jax.random.PRNGKey(0)
    k_up, k_dn, k_x, k_x1, k_g = jax.random.split(key, 5)
    w_up = jax.random.normal(k_up, (inter, hidden), jnp.float32) * 0.02
    w_dn = jax.random.normal(k_dn, (hidden, inter), jnp.float32) * 0.02

    layer_up = CustomMLPLayerPallas(w_up, num=1, sparsity=sparsity, start_num=0,
                                    token_sparsity=token_sparsity,
                                    memory_limit=False, cpu_only=False,
                                    name='up_proj', original_neurons_num=inter,
                                    siot_method_config=siot_cfg)
    layer_dn = CustomMLPLayerPallas(w_dn, num=1, sparsity=sparsity, start_num=0,
                                    token_sparsity=token_sparsity,
                                    memory_limit=False, cpu_only=False,
                                    name='down_proj', original_neurons_num=inter,
                                    siot_method_config=siot_cfg)

    # ---- prefill (seq > 1) ----
    x = jax.random.normal(k_x, (batch, seq, hidden), jnp.float32)
    h_up = jax.block_until_ready(layer_up(x))          # [B, S, inter]
    h_dn = jax.block_until_ready(layer_dn(h_up))       # [B, S, hidden]

    def ref_dense(a, w):   # bf16-operand / f32-accumulate reference (as kernel)
        return jax.lax.dot_general(
            a.astype(jnp.bfloat16), w.astype(jnp.bfloat16),
            dimension_numbers=(((a.ndim - 1,), (1,)), ((), ())),
            preferred_element_type=jnp.float32)

    np.testing.assert_allclose(np.asarray(h_up), np.asarray(ref_dense(x, w_up)),
                               rtol=1e-2, atol=1e-3)
    np.testing.assert_allclose(np.asarray(h_dn), np.asarray(ref_dense(h_up, w_dn)),
                               rtol=1e-2, atol=1e-3)

    # ---- decode (seq == 1), using the indices recorded by the down layer ----
    idx = INDICES_LIST_ALL[0]
    x1 = jax.random.normal(k_x1, (batch, 1, hidden), jnp.float32)
    d_up = jax.block_until_ready(layer_up(x1))          # [B, 1, K]
    d_dn = jax.block_until_ready(layer_dn(d_up))        # [B, 1, hidden]

    g_up = jnp.take(w_up, idx, axis=0).astype(jnp.bfloat16)        # [K, hidden]
    ref_d_up = jax.lax.dot_general(
        x1.reshape(batch, hidden).astype(jnp.bfloat16), g_up,
        dimension_numbers=(((1,), (1,)), ((), ())),
        preferred_element_type=jnp.float32)
    g_dn = jnp.take(w_dn, idx, axis=1).astype(jnp.bfloat16)        # [hidden, K]
    ref_d_dn = jax.lax.dot_general(
        d_up.reshape(batch, -1).astype(jnp.bfloat16), g_dn,
        dimension_numbers=(((1,), (1,)), ((), ())),
        preferred_element_type=jnp.float32)

    np.testing.assert_allclose(np.asarray(d_up).reshape(batch, -1),
                               np.asarray(ref_d_up), rtol=1e-2, atol=1e-3)
    np.testing.assert_allclose(np.asarray(d_dn).reshape(batch, -1),
                               np.asarray(ref_d_dn), rtol=1e-2, atol=1e-3)

    # ---- extra: multi-chunk decode gather exercising the coalesced base
    #      prefix (1 full base chunk) + scattered chunks + double buffering ----
    Rg, Cg, Kg, n_pref = 512, 256, 384, 192          # 3 chunks of 128
    w_big = jax.random.normal(k_g, (Rg, Cg), jnp.float32) * 0.02
    w_big_bf = w_big.astype(jnp.bfloat16)
    w_big_pack = _pack_bf16_rows_to_u32(w_big_bf)
    rng = np.random.RandomState(0)
    extra_ids = rng.choice(np.arange(n_pref, Rg), size=Kg - n_pref, replace=False)
    idx_big = jnp.concatenate([jnp.arange(n_pref, dtype=jnp.int32),
                               jnp.asarray(extra_ids, dtype=jnp.int32)])

    xu = jax.random.normal(jax.random.PRNGKey(3), (batch, Cg), jnp.float32)
    xu_bf = xu.astype(jnp.bfloat16)
    got_u = jax.block_until_ready(
        gathered_matmul_up(xu_bf[:, 0::2], xu_bf[:, 1::2], w_big_pack, idx_big,
                           n_pref, jnp.float32))
    ref_u = jax.lax.dot_general(
        xu_bf, jnp.take(w_big_bf, idx_big, axis=0),
        dimension_numbers=(((1,), (1,)), ((), ())),
        preferred_element_type=jnp.float32)
    np.testing.assert_allclose(np.asarray(got_u), np.asarray(ref_u),
                               rtol=1e-2, atol=1e-3)

    xd = jax.random.normal(jax.random.PRNGKey(4), (batch, Kg), jnp.float32)
    xd_bf = xd.astype(jnp.bfloat16)
    got_halves = jax.block_until_ready(
        gathered_matmul_down(xd_bf, w_big_pack, idx_big, n_pref, jnp.float32))
    got_d = jnp.stack([got_halves[:, :Cg // 2], got_halves[:, Cg // 2:]],
                      axis=-1).reshape(batch, Cg)
    ref_d = jnp.dot(xd_bf, jnp.take(w_big_bf, idx_big, axis=0),
                    preferred_element_type=jnp.float32)
    np.testing.assert_allclose(np.asarray(got_d), np.asarray(ref_d),
                               rtol=1e-2, atol=1e-3)

    print("KERNEL_OK")
</pallas_src>

<mosaic_0001>
module attributes {stable_mosaic.version = 11 : i64} {
  func.func @_dense_matmul_kernel(%arg0: i32, %arg1: i32, %arg2: i32, %arg3: memref<16x128xbf16, #tpu.memory_space<vmem>>, %arg4: memref<128x256xbf16, #tpu.memory_space<vmem>>, %arg5: memref<16x256xf32, #tpu.memory_space<vmem>>, %arg6: memref<16x256xf32, #tpu.memory_space<vmem>>) attributes {dimension_semantics = [#tpu.dimension_semantics<parallel>, #tpu.dimension_semantics<parallel>, #tpu.dimension_semantics<arbitrary>], iteration_bounds = array<i64: 1, 1, 1>, scalar_prefetch = 0 : i64, scratch_operands = 1 : i64, tpu.core_type = #tpu.core_type<tc>, window_params = [{transform_indices = @transform_0, window_bounds = array<i64: 16, 128>}, {transform_indices = @transform_1, window_bounds = array<i64: 128, 256>}, {transform_indices = @transform_2, window_bounds = array<i64: 16, 256>}]} {
    %c0_i32 = arith.constant 0 : i32
    %0 = arith.cmpi eq, %arg2, %c0_i32 : i32
    %1 = arith.extui %0 : i1 to i32
    %c0_i32_0 = arith.constant 0 : i32
    %2 = arith.cmpi ne, %1, %c0_i32_0 : i32
    scf.if %2 {
      %cst_10 = arith.constant 0.000000e+00 : f32
      %12 = vector.broadcast %cst_10 : f32 to vector<16x256xf32>
      %c0_11 = arith.constant 0 : index
      %c0_12 = arith.constant 0 : index
      %13 = vector.load %arg6[%c0_11, %c0_12] : memref<16x256xf32, #tpu.memory_space<vmem>>, vector<16x256xf32>
      tpu.vector_store %arg6[%c0_11, %c0_12], %12 {strides = array<i32>} : memref<16x256xf32, #tpu.memory_space<vmem>>, vector<16x256xf32>,
    } else {
    }
    %c0 = arith.constant 0 : index
    %c0_1 = arith.constant 0 : index
    %3 = vector.load %arg6[%c0, %c0_1] : memref<16x256xf32, #tpu.memory_space<vmem>>, vector<16x256xf32>
    %c0_2 = arith.constant 0 : index
    %c0_3 = arith.constant 0 : index
    %4 = vector.load %arg3[%c0_2, %c0_3] : memref<16x128xbf16, #tpu.memory_space<vmem>>, vector<16x128xbf16>
    %c0_4 = arith.constant 0 : index
    %c0_5 = arith.constant 0 : index
    %5 = vector.load %arg4[%c0_4, %c0_5] : memref<128x256xbf16, #tpu.memory_space<vmem>>, vector<128x256xbf16>
    %cst = arith.constant dense<0.000000e+00> : vector<16x256xf32>
    %6 = tpu.matmul %4, %5, %cst {dimension_numbers = #tpu.dot_dimension_numbers<[1], [0], [0], [1], [0, 0, 1, 1], [], []>} : vector<16x128xbf16>, vector<128x256xbf16>, vector<16x256xf32> -> vector<16x256xf32>
    %7 = arith.addf %3, %6 : vector<16x256xf32>
    %c0_6 = arith.constant 0 : index
    %c0_7 = arith.constant 0 : index
    %8 = vector.load %arg6[%c0_6, %c0_7] : memref<16x256xf32, #tpu.memory_space<vmem>>, vector<16x256xf32>
    tpu.vector_store %arg6[%c0_6, %c0_7], %7 {strides = array<i32>} : memref<16x256xf32, #tpu.memory_space<vmem>>, vector<16x256xf32>,
    %c0_i32_8 = arith.constant 0 : i32
    %9 = arith.cmpi eq, %arg2, %c0_i32_8 : i32
    %10 = arith.extui %9 : i1 to i32
    %c0_i32_9 = arith.constant 0 : i32
    %11 = arith.cmpi ne, %10, %c0_i32_9 : i32
    scf.if %11 {
      %c0_10 = arith.constant 0 : index
      %c0_11 = arith.constant 0 : index
      %12 = vector.load %arg6[%c0_10, %c0_11] : memref<16x256xf32, #tpu.memory_space<vmem>>, vector<16x256xf32>
      %c0_12 = arith.constant 0 : index
      %c0_13 = arith.constant 0 : index
      %13 = vector.load %arg5[%c0_12, %c0_13] : memref<16x256xf32, #tpu.memory_space<vmem>>, vector<16x256xf32>
      tpu.vector_store %arg5[%c0_12, %c0_13], %12 {strides = array<i32>} : memref<16x256xf32, #tpu.memory_space<vmem>>, vector<16x256xf32>,
    } else {
    }
    return
  }
  func.func @transform_0(%arg0: i32, %arg1: i32, %arg2: i32) -> (i32, i32) {
    %c0_i32 = arith.constant 0 : i32
    return %arg0, %arg2 : i32, i32
  }
  func.func @transform_1(%arg0: i32, %arg1: i32, %arg2: i32) -> (i32, i32) {
    %c0_i32 = arith.constant 0 : i32
    return %arg2, %arg1 : i32, i32
  }
  func.func @transform_2(%arg0: i32, %arg1: i32, %arg2: i32) -> (i32, i32) {
    %c0_i32 = arith.constant 0 : i32
    return %arg0, %arg1 : i32, i32
  }
}

</mosaic_0001>

<bundles_post_ra>
// kernel: tpu_custom_call.1
= control target key start
LH: loop header
LB: loop body
LE: loop exit
PB: predicated region body
PF: predicated region fallthrough
CT: control target
= control target key end

     0   :  { %7 = vsyncpa [#allocation4], 0  ;;  %s389_s0 = inlined_call_operand.hbm [shape: bf16[16,128], index: 0, kind: input, shape index: {}]   ;;  %s390_s1 = inlined_call_operand.hbm [shape: bf16[128,256], index: 1, kind: input, shape index: {}]   ;;  %s391_s2 = inlined_call_operand.hbm [shape: f32[16,256], index: 2, kind: output, shape index: {}]  }
   0x1   :  { %8 = vsyncpa [#allocation7], 0 }
   0x2   :  { %9 = vsyncpa [#allocation5], 0  ;;  %s355_s9 = smov [#allocation3]  }
   0x3   :  { %s15_s10 = sshll.u32 %s355_s9, 4  ;;  %s16_s10 = int_to_ptr.vmem [resolvable:$true] %s15_s10 }
   0x4   :  { %s297_s11 = scalar_lea.vmem %s16_s10, 128  ;;  %p302_p1 = scmp.lt.s32.totalorder %s16_s10, %s16_s10 }
   0x5   :  { %p298_p0 = scmp.ne.s32.totalorder %s16_s10, %s297_s11  ;;  %p303_p2 = scmp.lt.s32.totalorder %s297_s11, %s297_s11 }
   0x7   :  { %p304_p3 = por %p303_p2, %p302_p1 }
   0x9   :  { %p305_p4 = pnand %p304_p3, %p298_p0 }
   0xb   :  { %308 = shalt.err (!%p305_p4)
}
   0xc   :  { %s356_s12 = smov 64   ;;  %s357_s13 = smov 4  }
   0xd   :  { %21 = dma.hbm_to_vmem [thread:$0]  %s389_s0, 128, %s16_s10, [#allocation4], %s356_s12, %s356_s12, %s357_s13  }
   0xe   :  { %s358_s16 = smov [#allocation6]  }
   0xf   :  { %s27_s17 = sshll.u32 %s358_s16, 4  ;;  %s28_s17 = int_to_ptr.vmem [resolvable:$true] %s27_s17 }
  0x10   :  { %s317_s18 = scalar_lea.vmem %s28_s17, 2048  ;;  %p322_p6 = scmp.lt.s32.totalorder %s28_s17, %s28_s17 }
  0x11   :  { %p318_p5 = scmp.ne.s32.totalorder %s28_s17, %s317_s18  ;;  %p323_p7 = scmp.lt.s32.totalorder %s317_s18, %s317_s18 }
  0x13   :  { %p324_p8 = por %p323_p7, %p322_p6 }
  0x15   :  { %p325_p9 = pnand %p324_p8, %p318_p5 }
  0x17   :  { %328 = shalt.err (!%p325_p9)
}
  0x18   :  { %s359_s19 = smov 128   ;;  %s360_s20 = smov 8  }
  0x19   :  { %33 = dma.hbm_to_vmem [thread:$0]  %s390_s1, 2048, %s28_s17, [#allocation7], %s359_s19, %s359_s19, %s360_s20  }
  0x1a   :  { %349 = dma.done.wait [#allocation4], 128  }
  0x1b   :  { %350 = vsyncadd [#allocation4], 4294967168 }
  0x1c   :  { %351 = dma.done.wait [#allocation7], 2048  }
  0x1d   :  { %352 = vsyncadd [#allocation7], 4294965248  ;;  %v361_v0 = vmov 0   ;;  %v264_v1 = vld [vmem:[#allocation6 + $0x74] ss:$8 sps:$4 sm:$0xff]   ;;  %s362_s0 = smov [#allocation8]  }
  0x1e   :  { %189 = vmatprep.mubr.bf16.mxu0 %v361_v0  ;;  %v266_v2 = vld [vmem:[#allocation6 + $0x70] ss:$8 sps:$4 sm:$0xff]   ;;  %157 = vmatprep.subr.bf16.mxu0 %v264_v1  ;;  %v267_v3 = vld [vmem:[#allocation6 + $0x64] ss:$8 sps:$4 sm:$0xff]   ;;  %v269_v4 = vld [vmem:[#allocation6 + $0x60] ss:$8 sps:$4 sm:$0xff]  }
  0x1f   :  { %158 = vmatpush1.bf16.msra.mxu0 %v266_v2  ;;  %v270_v5 = vld [vmem:[#allocation6 + $0x54] ss:$8 sps:$4 sm:$0xff]   ;;  %v272_v6 = vld [vmem:[#allocation6 + $0x50] ss:$8 sps:$4 sm:$0xff]   ;;  %v273_v7 = vld [vmem:[#allocation6 + $0x44] ss:$8 sps:$4 sm:$0xff]  }
  0x20   :  { %159 = vmatprep.subr.bf16.mxu0 %v267_v3  ;;  %v275_v8 = vld [vmem:[#allocation6 + $0x40] ss:$8 sps:$4 sm:$0xff]   ;;  %v276_v9 = vld [vmem:[#allocation6 + $0x34] ss:$8 sps:$4 sm:$0xff]   ;;  %v278_v10 = vld [vmem:[#allocation6 + $0x30] ss:$8 sps:$4 sm:$0xff]  }
  0x21   :  { %v279_v11 = vld [vmem:[#allocation6 + $0x24] ss:$8 sps:$4 sm:$0xff]   ;;  %v281_v12 = vld [vmem:[#allocation6 + $0x20] ss:$8 sps:$4 sm:$0xff]   ;;  %v282_v13 = vld [vmem:[#allocation6 + $0x14] ss:$8 sps:$4 sm:$0xff]  }
  0x22   :  { %v284_v14 = vld [vmem:[#allocation6 + $0x10] ss:$8 sps:$4 sm:$0xff]   ;;  %v285_v15 = vld [vmem:[#allocation6 + $0x4] ss:$8 sps:$4 sm:$0xff]   ;;  %v287_v16 = vld [vmem:[#allocation6] ss:$8 sps:$4 sm:$0xff]  }
  0x23   :  { %160 = vmatpush1.bf16.msra.mxu0 %v269_v4  ;;  %v288_v17 = vld [vmem:[#allocation3] sm:$0xff]   ;;  %s224_s1 = sshll.u32 %s362_s0, 4  ;;  %s225_s1 = int_to_ptr.vmem [resolvable:$true] %s224_s1 }
  0x24   :  { %161 = vmatprep.subr.bf16.mxu0 %v270_v5  ;;  %s329_s23 = scalar_lea.vmem %s225_s1, 512  ;;  %p334_p11 = scmp.lt.s32.totalorder %s225_s1, %s225_s1 }
  0x25   :  { %p330_p10 = scmp.ne.s32.totalorder %s225_s1, %s329_s23  ;;  %p335_p12 = scmp.lt.s32.totalorder %s329_s23, %s329_s23 }
  0x27   :  { %162 = vmatpush1.bf16.msra.mxu0 %v272_v6  ;;  %p336_p13 = por %p335_p12, %p334_p11 }
  0x28   :  { %163 = vmatprep.subr.bf16.mxu0 %v273_v7 }
  0x29   :  { %p337_p0 = pnand %p336_p13, %p330_p10 }
  0x2b   :  { %164 = vmatpush1.bf16.msra.mxu0 %v275_v8 }
  0x2c   :  { %165 = vmatprep.subr.bf16.mxu0 %v276_v9 }
  0x2f   :  { %166 = vmatpush1.bf16.msra.mxu0 %v278_v10 }
  0x30   :  { %167 = vmatprep.subr.bf16.mxu0 %v279_v11 }
  0x33   :  { %168 = vmatpush1.bf16.msra.mxu0 %v281_v12 }
  0x34   :  { %169 = vmatprep.subr.bf16.mxu0 %v282_v13 }
  0x37   :  { %170 = vmatpush1.bf16.msra.mxu0 %v284_v14 }
  0x38   :  { %171 = vmatprep.subr.bf16.mxu0 %v285_v15 }
  0x3b   :  { %172 = vmatpush1.bf16.msra.mxu0 %v287_v16 }
  0x3e   :  { %190 = vmatmul.mubr.bf16.vlgmr.msra.gmra.mxu0 %v288_v17 }
  0xfe   :  { %v191_v18 = vpop.f32.mrf.mxu0 }
  0xff   :  { %215 = vst [vmem:[#allocation8] sm:$0xff] %v191_v18 }
 0x100   :  { %v193_v19 = vpop.f32.mrf.mxu0 }
 0x101   :  { %216 = vst [vmem:[#allocation8 + $0x8] sm:$0xff] %v193_v19 }
 0x102   :  { %v195_v20 = vpop.f32.mrf.mxu0 }
 0x103   :  { %217 = vst [vmem:[#allocation8 + $0x10] sm:$0xff] %v195_v20 }
 0x104   :  { %v197_v21 = vpop.f32.mrf.mxu0 }
 0x105   :  { %218 = vst [vmem:[#allocation8 + $0x18] sm:$0xff] %v197_v21 }
 0x106   :  { %340 = shalt.err (!%p337_p0)
}
 0x107   :  { %s363_s24 = smov 256   ;;  %s364_s25 = smov 16  }
 0x108   :  { %230 = dma.vmem_to_hbm [thread:$0]  %s225_s1, 512, %s391_s2, [#allocation5], %s363_s24, %s363_s24, %s364_s25  }
 0x109   :  { %353 = dma.done.wait [#allocation5], 512  }
 0x10a   :  { %354 = vsyncadd [#allocation5], 4294966784 }
 0x10b   :  { %234 = vsyncpa [#allocation4], 1 }
 0x10c   :  { %235 = vsyncpa [#allocation7], 1 }
 0x10d   :  { %236 = vsyncpa [#allocation5], 1 }

</bundles_post_ra>
